<compile_context>
chip_gen: v7x
topology: tpu7x:2x2x1
jax: 0.10.0
libtpu: 0.0.40
codegen_flags: <defaults>
</compile_context>

<pallas_src>
import jax
import jax.numpy as jnp
import numpy as np
from jax.experimental import pallas as pl
from jax.experimental.pallas import tpu as pltpu

_LANES = 128
_SUBLANES = 8
# ~2 MiB per VMEM buffer (input + output, each double-buffered -> ~8 MiB).
_TARGET_BLOCK_BYTES = 2 * 1024 * 1024


def _rerange_kernel(x_ref, o_ref):
    # Single fused elementwise pass on the VPU; cast back in case the input
    # dtype is not floating (promotion inside the arithmetic).
    x = x_ref[...]
    o_ref[...] = ((x + 1.0) * 0.5).astype(o_ref.dtype)


def _pick_block_rows(rows, itemsize):
    """Dtype-scaled block height (multiple of 8), aiming for >= 8 grid steps."""
    max_rows = max(
        _SUBLANES,
        (_TARGET_BLOCK_BYTES // (_LANES * itemsize)) // _SUBLANES * _SUBLANES,
    )
    if rows <= _SUBLANES:
        # Single block equal to the full array extent (allowed even if < 8).
        return rows
    # Aim for >= 8 grid steps so the "parallel" axis shards across v7x TCs;
    # round the block height up to a multiple of 8 sublanes.
    target = pl.cdiv(rows, 8)
    target = ((target + _SUBLANES - 1) // _SUBLANES) * _SUBLANES
    return int(min(max_rows, target))


def _rerange_2d(x2d, block_rows, donate_input):
    rows, lanes = x2d.shape
    itemsize = jnp.dtype(x2d.dtype).itemsize
    n = rows * lanes
    return pl.pallas_call(
        _rerange_kernel,
        out_shape=jax.ShapeDtypeStruct((rows, lanes), x2d.dtype),
        grid=(pl.cdiv(rows, block_rows),),
        in_specs=[pl.BlockSpec((block_rows, lanes), lambda i: (i, 0))],
        out_specs=pl.BlockSpec((block_rows, lanes), lambda i: (i, 0)),
        compiler_params=pltpu.CompilerParams(
            dimension_semantics=("parallel",)),
        cost_estimate=pl.CostEstimate(
            flops=2 * n, transcendentals=0, bytes_accessed=2 * n * itemsize),
        input_output_aliases=({0: 0} if donate_input else {}),
    )(x2d)


def rerange_forward(x, donate_input=False):
    """(x + 1.0) / 2.0 for an arbitrarily shaped array, via a Pallas kernel.

    Set donate_input=True only when the caller donates x (input dead after
    the call); it lets XLA reuse the input HBM buffer for the output.
    """
    orig_shape = x.shape
    dtype = x.dtype
    total = int(np.prod(orig_shape)) if len(orig_shape) else 1
    if total == 0:
        return x  # empty tensor: nothing to compute
    itemsize = jnp.dtype(dtype).itemsize

    flat = x.reshape(-1)
    main = (total // _LANES) * _LANES
    rem = total - main

    if main == 0:
        # Fewer than 128 elements: a kernel launch is pure overhead.
        return ((flat + 1.0) * 0.5).astype(dtype).reshape(orig_shape)

    if rem == 0:
        # Common case: lane-dense (rows, 128) slab, no padding, no extra copies.
        rows = main // _LANES
        block_rows = _pick_block_rows(rows, itemsize)
        out2d = _rerange_2d(flat.reshape(rows, _LANES), block_rows, donate_input)
        return out2d.reshape(orig_shape)

    # Rare misaligned case: kernel on the 128-aligned prefix, plain jnp on the
    # <=127-element tail (replaces the old full-tensor pad/concat/slice path).
    rows = main // _LANES
    block_rows = _pick_block_rows(rows, itemsize)
    main_out = _rerange_2d(flat[:main].reshape(rows, _LANES), block_rows, False)
    tail_out = ((flat[main:] + 1.0) * 0.5).astype(dtype)
    return jnp.concatenate([main_out.reshape(-1), tail_out]).reshape(orig_shape)


def _reference(x):
    return (x + 1.0) / 2.0


if __name__ == "__main__":
    N, C, H, W = 2, 4, 16, 16
    key = jax.random.PRNGKey(0)
    x = jax.random.normal(key, (N, C, H, W), dtype=jnp.float32)

    out = jax.block_until_ready(rerange_forward(x))
    ref = jax.block_until_ready(_reference(x))

    np.testing.assert_allclose(np.asarray(out), np.asarray(ref),
                               rtol=1e-6, atol=1e-6)
    print("KERNEL_OK")
</pallas_src>

<mosaic_0001>
module attributes {stable_mosaic.version = 11 : i64} {
  func.func @_rerange_kernel(%arg0: i32, %arg1: memref<8x128xf32, #tpu.memory_space<vmem>>, %arg2: memref<8x128xf32, #tpu.memory_space<vmem>>) attributes {dimension_semantics = [#tpu.dimension_semantics<parallel>], iteration_bounds = array<i64: 2>, scalar_prefetch = 0 : i64, scratch_operands = 0 : i64, tpu.core_type = #tpu.core_type<tc>, window_params = [{transform_indices = @transform_0, window_bounds = array<i64: 8, 128>}, {transform_indices = @transform_1, window_bounds = array<i64: 8, 128>}]} {
    %c0 = arith.constant 0 : index
    %c0_0 = arith.constant 0 : index
    %0 = vector.load %arg1[%c0, %c0_0] : memref<8x128xf32, #tpu.memory_space<vmem>>, vector<8x128xf32>
    %cst = arith.constant 1.000000e+00 : f32
    %1 = vector.broadcast %cst : f32 to vector<8x128xf32>
    %2 = arith.addf %0, %1 : vector<8x128xf32>
    %cst_1 = arith.constant 5.000000e-01 : f32
    %3 = vector.broadcast %cst_1 : f32 to vector<8x128xf32>
    %4 = arith.mulf %2, %3 : vector<8x128xf32>
    %c0_2 = arith.constant 0 : index
    %c0_3 = arith.constant 0 : index
    %5 = vector.load %arg2[%c0_2, %c0_3] : memref<8x128xf32, #tpu.memory_space<vmem>>, vector<8x128xf32>
    tpu.vector_store %arg2[%c0_2, %c0_3], %4 {strides = array<i32>} : memref<8x128xf32, #tpu.memory_space<vmem>>, vector<8x128xf32>,
    return
  }
  func.func @transform_0(%arg0: i32) -> (i32, i32) {
    %c0_i32 = arith.constant 0 : i32
    %c0_i32_0 = arith.constant 0 : i32
    return %arg0, %c0_i32 : i32, i32
  }
  func.func @transform_1(%arg0: i32) -> (i32, i32) {
    %c0_i32 = arith.constant 0 : i32
    %c0_i32_0 = arith.constant 0 : i32
    return %arg0, %c0_i32 : i32, i32
  }
}

</mosaic_0001>

<bundles_post_ra>
// kernel: tpu_custom_call.1
= control target key start
LH: loop header
LB: loop body
LE: loop exit
PB: predicated region body
PF: predicated region fallthrough
CT: control target
= control target key end

     0   :  { %6 = vsyncpa [#allocation3], 0  ;;  %s549_s0 = inlined_call_operand.hbm [shape: f32[16,128], index: 0, kind: input, shape index: {}]   ;;  %s550_s1 = inlined_call_operand.hbm [shape: f32[16,128], index: 1, kind: output, shape index: {}]  }
   0x1   :  { %8 = vsyncpa [#allocation3 + $0x1], 0 }
   0x2   :  { %9 = vsyncpa [#allocation4], 0 }
   0x3   :  { %11 = vsyncpa [#allocation4 + $0x1], 0  ;;  %s388_s6 = smov 0   ;;  %s390_s7 = smov 0  }
   0x4   :  { %s392_s8 = smov 0   ;;  %s394_s9 = smov 0  }
   0x5 LB: > { %s409_s10 = sadd.s32 4294967295, %s374_s9   ;;  %s220_s11 = sadd.s32 4294967294, %s374_s9   ;;  %s374_s9 = sphi %s394_s9, %s565_s9   ;;  %s370_s8 = sphi %s392_s8, %s564_s8   ;;  %s366_s7 = sphi %s390_s7, %s563_s7   ;;  %s362_s6 = sphi %s388_s6, %s562_s6  }
   0x6   : > { %s413_s12 = sadd.s32 1, %s374_s9   ;;  %s24_s13 = sadd.s32 1, %s370_s8 }
   0x7   : > { %s21_s14 = ssub.s32 %s374_s9, %s413_s12  ;;  %p31_p0 = scmp.ne.s32.totalorder %s370_s8, %s366_s7 }
   0x8   : > { %p22_p1 = scmp.eq.s32.totalorder %s21_s14, 0  ;;  %p32_p2 = scmp.eq.s32.totalorder %s374_s9, 0 }
   0x9   : > { %p37_p3 = scmp.ne.s32.totalorder %s366_s7, %s362_s6  ;;  %p38_p4 = scmp.eq.s32.totalorder %s409_s10, 0 }
   0xa   : > { %s425_s15 = scalar_select %p22_p1, %s370_s8, %s24_s13  }
   0xb   : > { %p427_p5 = por %p32_p2, %p31_p0  ;;  %p431_p6 = por %p38_p4, %p37_p3 }
   0xc   : > { %p61_p7 = scmp.eq.s32.totalorder %s409_s10, 1  ;;  %p67_p8 = scmp.eq.s32.totalorder %s220_s11, 1 }
   0xd   : > { %p244_p10 = scmp.lt.s32.totalorder %s374_s9, 2  ;;  %s87_s20 = sand.u32 1, %s370_s8  }
   0xe   : > { %p438_p11 = por %p61_p7, %p31_p0  ;;  %p442_p12 = por %p67_p8, %p37_p3 }
   0xf   : > { %s224_s21 = sshll.u32 %s374_s9, 7  ;;  %s223_s22 = sshll.u32 %s87_s20, 3 }
  0x10   : > { %s554_s18 = scalar_select %p438_p11, 1, 0 }
  0x11   : > { %s555_s19 = scalar_select %p442_p12, 1, 0 }
  0x12   : > { %s451_s25 = scalar_lea.hbm %s549_s0, %s224_s21  ;;  %s91_s26 = scalar_lea.vmem [#allocation2], %s223_s22 }
  0x13   : > { %s98_s27 = sshll.u32 %s91_s26, 4  ;;  %p455_p13 = pnand %p244_p10, %p427_p5  ;;  %s459_s27 = int_to_ptr.vmem [resolvable:$true] %s98_s27 }
  0x14   : > { %s88_s29 = scalar_lea.sflag [#allocation3], %s87_s20  ;;  %s278_s30 = scalar_lea.hbm %s451_s25, 128 }
  0x15   : > { %p279_p2 = scmp.ne.s32.totalorder %s451_s25, %s278_s30  ;;  %p280_p3 = pneg %p455_p13 }
  0x16   : > { %s283_s4 = scalar_lea.hbm %s549_s0, 256  ;;  %p284_p5 = scmp.lt.u32.totalorder %s451_s25, %s549_s0 }
  0x17   : > { %p281_p4 = pnand %p280_p3, %p279_p2  ;;  %p285_p8 = scmp.lt.u32.totalorder %s283_s4, %s278_s30 }
  0x18   : > { %p287_p9 = scmp.lt.u32.totalorder %s278_s30, %s451_s25 }
  0x19   : > { %p282_p7 = pneg %p281_p4  ;;  %p286_p10 = por %p285_p8, %p284_p5 }
  0x1b   : > { %p288_p0 = por %p287_p9, %p286_p10 }
  0x1d   : > { %p289_p1 = pnand %p288_p0, %p282_p7 }
  0x1f   : > { %292 = shalt.err (!%p289_p1)
}
  0x20   : > { %s293_s13 = scalar_lea.vmem %s459_s27, 128  ;;  %s376_s14 = smov [#allocation2]  }
  0x21   : > { %p294_p2 = scmp.ne.s32.totalorder %s459_s27, %s293_s13  ;;  %s298_s16 = sshll.u32 %s376_s14, 4  ;;  %s299_s16 = int_to_ptr.vmem [resolvable:$false] %s298_s16 }
  0x22   : > { %s300_s20 = scalar_lea.vmem %s299_s16, 256  ;;  %p301_p11 = scmp.lt.s32.totalorder %s459_s27, %s299_s16 }
  0x23   : > { %p296_p4 = pnand %p294_p2, %p280_p3  ;;  %p302_p5 = scmp.lt.s32.totalorder %s300_s20, %s293_s13 }
  0x25   : > { %p297_p12 = pneg %p296_p4  ;;  %p303_p8 = por %p302_p5, %p301_p11 }
  0x27   : > { %p304_p9 = pnand %p303_p8, %p297_p12 }
  0x29   : > { %307 = shalt.err (!%p304_p9)
}
  0x2a   : > { %239 = dma.hbm_to_vmem [thread:$0]  (!%p455_p13), %s451_s25, 128, %s459_s27, %s88_s29  }
  0x2b   : > { %p557_p0 = scmp.lt.s32.totalorder %s374_s9, 3  ;;  %p558_p1 = scmp.ge.s32.totalorder %s374_s9, 1 }
  0x2d   : > { %p104_p3 = pnand %p558_p1, %p557_p0 }
  0x2e   : > { %s493_s21 = sand.u32 (!%p104_p3), 1, %s366_s7  }
  0x2f   : > { %107 = sbr.rel (%p104_p3) target bundleno = 81 (0x51), region = 24  ;;  %s226_s22 = sshll.u32 (!%p104_p3), %s493_s21, 3 }
  0x30   : > { %s110_s23 = scalar_lea.sflag (!%p104_p3), [#allocation3], %s493_s21  ;;  %s113_s24 = scalar_lea.vmem (!%p104_p3), [#allocation2], %s226_s22 }
  0x36   : > { %353 = dma.done.wait (%p431_p6), %s110_s23, 128  }
  0x37   : > { %355 = vsyncadd (%p431_p6), %s110_s23, 4294967168  ;;  %v132_v0 = vld [vmem:[%s113_s24] sm:$0xff]  ;;  %s131_s25 = scalar_lea.vmem [#allocation5], %s226_s22  ;;  %s229_s27 = sshll.u32 %s409_s10, 7 }
  0x38   : > { %s150_s26 = sshll.u32 %s131_s25, 4  ;;  %v133_v1 = vadd.f32 1.0, %v132_v0  ;;  %s507_s30 = scalar_lea.hbm %s550_s1, %s229_s27  ;;  %s502_s26 = int_to_ptr.vmem [resolvable:$true] %s150_s26 }
  0x39   : > { %s137_s17 = scalar_lea.sflag [#allocation4], %s493_s21  ;;  %s308_s2 = scalar_lea.vmem %s502_s26, 128 }
  0x3a   : > { %v134_v2 = vmul.f32 0.5, %v133_v1  ;;  %p309_p6 = scmp.ne.s32.totalorder %s502_s26, %s308_s2  ;;  %p559_p11 = scmp.ne.s32.totalorder %s554_s18, 0 }
  0x3b   : > { %s377_s10 = smov [#allocation5]  }
  0x3c   : > { %135 = vst [vmem:[%s131_s25] sm:$0xff] %v134_v2  ;;  %p310_p12 = pnand %p309_p6, %p559_p11  ;;  %s312_s3 = sshll.u32 %s377_s10, 4  ;;  %s313_s3 = int_to_ptr.vmem [resolvable:$false] %s312_s3 }
  0x3d   : > { %s314_s4 = scalar_lea.vmem %s313_s3, 256  ;;  %p315_p7 = scmp.lt.s32.totalorder %s502_s26, %s313_s3 }
  0x3e   : > { %p311_p13 = pneg %p310_p12  ;;  %p316_p10 = scmp.lt.s32.totalorder %s314_s4, %s308_s2 }
  0x40   : > { %p317_p2 = por %p316_p10, %p315_p7 }
  0x42   : > { %p318_p4 = pnand %p317_p2, %p311_p13 }
  0x44   : > { %321 = shalt.err (!%p318_p4)
}
  0x45   : > { %s322_s5 = scalar_lea.hbm %s507_s30, 128  ;;  %s326_s14 = scalar_lea.hbm %s550_s1, 256 }
  0x46   : > { %p323_p5 = scmp.ne.s32.totalorder %s507_s30, %s322_s5  ;;  %p327_p0 = scmp.lt.u32.totalorder %s507_s30, %s550_s1 }
  0x47   : > { %p328_p1 = scmp.lt.u32.totalorder %s326_s14, %s322_s5  ;;  %p330_p6 = scmp.lt.u32.totalorder %s322_s5, %s507_s30 }
  0x48   : > { %p324_p8 = pnand %p323_p5, %p559_p11 }
  0x49   : > { %p329_p3 = por %p328_p1, %p327_p0 }
  0x4a   : > { %p325_p9 = pneg %p324_p8 }
  0x4b   : > { %p331_p12 = por %p330_p6, %p329_p3 }
  0x4d   : > { %p332_p13 = pnand %p331_p12, %p325_p9 }
  0x4f   : > { %335 = shalt.err (!%p332_p13)
}
  0x50   : > { %234 = dma.vmem_to_hbm [thread:$0]  (%p559_p11), %s502_s26, 128, %s507_s30, %s137_s17  }
  0x51 PF: > { %s162_s21 = sand.u32 1, %s362_s6   ;;  %p560_p7 = scmp.ne.s32.totalorder %s555_s19, 0 }
  0x52   : > { %p561_p10 = scmp.ge.s32.totalorder %s374_s9, 2  ;;  %s163_s22 = scalar_lea.sflag [#allocation4], %s162_s21 }
  0x54   : > { %p241_p2 = pnand %p561_p10, %p560_p7 }
  0x56   : > { %357 = dma.done.wait (!%p241_p2), %s163_s22, 128  }
  0x57   : > { %359 = vsyncadd (!%p241_p2), %s163_s22, 4294967168  ;;  %p14_p4 = scmp.ge.s32.totalorder %s413_s12, 4   ;;  %s562_s6 = smov %s366_s7 }
  0x58   : > { %s563_s7 = smov %s370_s8  ;;  %s564_s8 = smov %s425_s15 }
  0x59   : > { %s565_s9 = smov %s413_s12  ;;  %16 = sbr.rel (!%p14_p4) target bundleno = 5 (0x5), region = 69 }
  0x60   :  { %168 = vsyncpa [#allocation3], 1 }
  0x61   :  { %170 = vsyncpa [#allocation3 + $0x1], 1 }
  0x62   :  { %171 = vsyncpa [#allocation4], 1 }
  0x63   :  { %173 = vsyncpa [#allocation4 + $0x1], 1 }

</bundles_post_ra>
